<compile_context>
chip_gen: v6e
topology: v6e:2x2x1
jax: 0.10.0
libtpu: 0.0.40
codegen_flags: <defaults>
</compile_context>

<pallas_src>
import jax
import jax.numpy as jnp
from jax import lax
from jax.experimental import pallas as pl
from jax.experimental.pallas import tpu as pltpu

_SUB = 8      # f32 sublane quantum
_LANE = 128   # lane quantum


def _round_up(x, m):
    return ((x + m - 1) // m) * m


def _bow_kernel(x_ref, w_ref, b_ref, o_ref, acc_ref):
    # x_ref:   (tb, tv)        streamed X tile (double-buffered)
    # w_ref:   (L_pad, V_pad)  full weight matrix, VMEM-resident (Buffered(1))
    # b_ref:   (1, L_pad)      bias (padded labels hold -1e30)
    # o_ref:   (tb, L_pad)     output tile (constant across k)
    # acc_ref: (tb, L_pad)     f32 accumulator scratch
    k = pl.program_id(1)
    tv = x_ref.shape[1]

    @pl.when(k == 0)
    def _():
        # Fold the bias into the accumulator init (hoisted broadcast).
        acc_ref[...] = jnp.broadcast_to(
            b_ref[...].astype(jnp.float32), acc_ref.shape
        )

    # Slice the resident W at this vocab chunk; contract on the V axis of both
    # operands -> MXU directly, no materialized w.T / XLU transpose.
    off = pl.multiple_of(k * tv, _LANE)
    w_blk = w_ref[:, pl.ds(off, tv)]
    acc_ref[...] += lax.dot_general(
        x_ref[...],
        w_blk,
        dimension_numbers=(((1,), (1,)), ((), ())),
        preferred_element_type=jnp.float32,
    )

    @pl.when(k == pl.num_programs(1) - 1)
    def _():
        logits = acc_ref[...]
        # Numerically-stable log_softmax along the label axis.
        m = jnp.max(logits, axis=1, keepdims=True)
        shifted = logits - m
        lse = jnp.log(jnp.sum(jnp.exp(shifted), axis=1, keepdims=True))
        o_ref[...] = (shifted - lse).astype(o_ref.dtype)


def bow_classifier_forward(bow_vec, weight, bias, *, tb=512, tv=4096):
    B, V = bow_vec.shape
    L, V_w = weight.shape
    assert V_w == V

    # Label axis: pad only to the f32 sublane minimum (8), not 128.
    L_pad = _round_up(max(L, _SUB), _SUB)

    # Batch tile: cap at ceil(B/2) so there are >=2 "parallel" blocks when the
    # batch allows it (lets a v7x megacore shard over both TensorCores).
    tb = max(_SUB, min(tb, _round_up(pl.cdiv(B, 2), _SUB)))
    tv = min(tv, _round_up(V, _LANE))
    B_pad = _round_up(B, tb)
    V_pad = _round_up(V, tv)

    x = bow_vec
    if (B_pad, V_pad) != (B, V):
        x = jnp.pad(x, ((0, B_pad - B), (0, V_pad - V)))
    w = weight.astype(jnp.float32)
    if (L_pad, V_pad) != (L, V):
        w = jnp.pad(w, ((0, L_pad - L), (0, V_pad - V)))
    # Padded labels: very negative bias + zero W rows => accumulator stays at
    # -1e30, exp underflows to 0, real labels' max/logsumexp are untouched.
    b2 = jnp.pad(
        bias.reshape(1, L).astype(jnp.float32),
        ((0, 0), (0, L_pad - L)),
        constant_values=-1e30,
    )

    grid = (B_pad // tb, V_pad // tv)

    # VMEM budget: double-buffered X, single-buffered resident W + bias,
    # double-buffered out + f32 accumulator scratch, plus headroom.
    vmem_needed = (
        2 * tb * tv * 4
        + L_pad * V_pad * 4
        + 2 * L_pad * 4
        + 2 * tb * L_pad * 4
        + tb * L_pad * 4
    )
    vmem_limit = max(int(vmem_needed * 1.25) + (2 << 20), 32 << 20)

    cost = pl.CostEstimate(
        flops=2 * B_pad * V_pad * L_pad + 5 * B_pad * L_pad,
        transcendentals=B_pad * (L_pad + 1),
        bytes_accessed=4 * (B_pad * V_pad + L_pad * V_pad + L_pad
                            + B_pad * L_pad),
    )

    out = pl.pallas_call(
        _bow_kernel,
        out_shape=jax.ShapeDtypeStruct((B_pad, L_pad), bow_vec.dtype),
        grid_spec=pltpu.PrefetchScalarGridSpec(
            num_scalar_prefetch=0,
            grid=grid,
            in_specs=[
                # X: streamed over (batch, vocab) tiles.
                pl.BlockSpec((tb, tv), lambda i, k: (i, k)),
                # W: fully VMEM-resident (constant index, single buffer) so it
                # is DMA'd exactly once, not once per batch tile.
                pl.BlockSpec(
                    (L_pad, V_pad),
                    lambda i, k: (0, 0),
                    pipeline_mode=pl.Buffered(1),
                ),
                # Bias: tiny, constant index, single buffer.
                pl.BlockSpec(
                    (1, L_pad),
                    lambda i, k: (0, 0),
                    pipeline_mode=pl.Buffered(1),
                ),
            ],
            # Output block fixed across k -> accumulator-resident per batch
            # tile; written once in the last-K epilogue.
            out_specs=pl.BlockSpec((tb, L_pad), lambda i, k: (i, 0)),
            scratch_shapes=[pltpu.VMEM((tb, L_pad), jnp.float32)],
        ),
        compiler_params=pltpu.CompilerParams(
            dimension_semantics=("parallel", "arbitrary"),
            vmem_limit_bytes=vmem_limit,
        ),
        cost_estimate=cost,
    )(x, w, b2)

    return out[:B, :L]


def reference_forward(bow_vec, weight, bias):
    logits = bow_vec @ weight.T + bias
    return jax.nn.log_softmax(logits, axis=1)


if __name__ == "__main__":
    # Small, module-consistent shapes: batch=8, vocab_size=128, num_labels=4
    batch, vocab_size, num_labels = 8, 128, 4

    key = jax.random.PRNGKey(0)
    kx, kw, kb = jax.random.split(key, 3)

    # Deterministic "bag of words" counts and linear parameters.
    bow_vec = jax.random.randint(kx, (batch, vocab_size), 0, 5).astype(jnp.float32)
    bound = 1.0 / jnp.sqrt(vocab_size)
    weight = jax.random.uniform(
        kw, (num_labels, vocab_size), minval=-bound, maxval=bound, dtype=jnp.float32
    )
    bias = jax.random.uniform(
        kb, (num_labels,), minval=-bound, maxval=bound, dtype=jnp.float32
    )

    out = bow_classifier_forward(bow_vec, weight, bias)
    out = jax.block_until_ready(out)

    ref = reference_forward(bow_vec, weight, bias)
    assert out.shape == (batch, num_labels)
    assert jnp.allclose(out, ref, atol=1e-5, rtol=1e-5)

    print("KERNEL_OK")
</pallas_src>

<mosaic_0001>
module attributes {stable_mosaic.version = 11 : i64} {
  func.func @_bow_kernel(%arg0: i32, %arg1: i32, %arg2: memref<8x128xf32, #tpu.memory_space<vmem>>, %arg3: memref<8x128xf32, #tpu.memory_space<vmem>>, %arg4: memref<1x8xf32, #tpu.memory_space<vmem>>, %arg5: memref<8x8xf32, #tpu.memory_space<vmem>>, %arg6: memref<8x8xf32, #tpu.memory_space<vmem>>) attributes {dimension_semantics = [#tpu.dimension_semantics<parallel>, #tpu.dimension_semantics<arbitrary>], iteration_bounds = array<i64: 1, 1>, scalar_prefetch = 0 : i64, scratch_operands = 1 : i64, tpu.core_type = #tpu.core_type<tc>, window_params = [{transform_indices = @transform_0, window_bounds = array<i64: 8, 128>}, {pipeline_mode = #tpu.pipeline_mode<synchronous>, transform_indices = @transform_1, window_bounds = array<i64: 8, 128>}, {pipeline_mode = #tpu.pipeline_mode<synchronous>, transform_indices = @transform_2, window_bounds = array<i64: 1, 8>}, {transform_indices = @transform_3, window_bounds = array<i64: 8, 8>}]} {
    %c0_i32 = arith.constant 0 : i32
    %0 = arith.cmpi eq, %arg1, %c0_i32 : i32
    %1 = arith.extui %0 : i1 to i32
    %c0_i32_0 = arith.constant 0 : i32
    %2 = arith.cmpi ne, %1, %c0_i32_0 : i32
    scf.if %2 {
      %c0_9 = arith.constant 0 : index
      %c0_10 = arith.constant 0 : index
      %15 = vector.load %arg4[%c0_9, %c0_10] : memref<1x8xf32, #tpu.memory_space<vmem>>, vector<1x8xf32>
      %16 = vector.shape_cast %15 : vector<1x8xf32> to vector<1x8xf32>
      %17 = vector.broadcast %16 : vector<1x8xf32> to vector<8x8xf32>
      %c0_11 = arith.constant 0 : index
      %c0_12 = arith.constant 0 : index
      %18 = vector.load %arg6[%c0_11, %c0_12] : memref<8x8xf32, #tpu.memory_space<vmem>>, vector<8x8xf32>
      tpu.vector_store %arg6[%c0_11, %c0_12], %17 {strides = array<i32>} : memref<8x8xf32, #tpu.memory_space<vmem>>, vector<8x8xf32>,
    } else {
    }
    %c128_i32 = arith.constant 128 : i32
    %3 = arith.muli %arg1, %c128_i32 : i32
    %4 = tpu.assume_multiple %3, 128 : i32
    %c0 = arith.constant 0 : index
    %5 = arith.index_cast %4 : i32 to index
    %6 = vector.load %arg3[%c0, %5] : memref<8x128xf32, #tpu.memory_space<vmem>>, vector<8x128xf32>
    %c0_1 = arith.constant 0 : index
    %c0_2 = arith.constant 0 : index
    %7 = vector.load %arg6[%c0_1, %c0_2] : memref<8x8xf32, #tpu.memory_space<vmem>>, vector<8x8xf32>
    %c0_3 = arith.constant 0 : index
    %c0_4 = arith.constant 0 : index
    %8 = vector.load %arg2[%c0_3, %c0_4] : memref<8x128xf32, #tpu.memory_space<vmem>>, vector<8x128xf32>
    %cst = arith.constant dense<0.000000e+00> : vector<8x8xf32>
    %9 = tpu.matmul %8, %6, %cst {dimension_numbers = #tpu.dot_dimension_numbers<[1], [1], [0], [0], [0, 0, 1, 0], [], []>} : vector<8x128xf32>, vector<8x128xf32>, vector<8x8xf32> -> vector<8x8xf32>
    %10 = arith.addf %7, %9 : vector<8x8xf32>
    %c0_5 = arith.constant 0 : index
    %c0_6 = arith.constant 0 : index
    %11 = vector.load %arg6[%c0_5, %c0_6] : memref<8x8xf32, #tpu.memory_space<vmem>>, vector<8x8xf32>
    tpu.vector_store %arg6[%c0_5, %c0_6], %10 {strides = array<i32>} : memref<8x8xf32, #tpu.memory_space<vmem>>, vector<8x8xf32>,
    %c0_i32_7 = arith.constant 0 : i32
    %12 = arith.cmpi eq, %arg1, %c0_i32_7 : i32
    %13 = arith.extui %12 : i1 to i32
    %c0_i32_8 = arith.constant 0 : i32
    %14 = arith.cmpi ne, %13, %c0_i32_8 : i32
    scf.if %14 {
      %c0_9 = arith.constant 0 : index
      %c0_10 = arith.constant 0 : index
      %15 = vector.load %arg6[%c0_9, %c0_10] : memref<8x8xf32, #tpu.memory_space<vmem>>, vector<8x8xf32>
      %cst_11 = arith.constant dense<0xFF800000> : vector<8xf32>
      %16 = vector.multi_reduction <maximumf>, %15, %cst_11 [1] : vector<8x8xf32> to vector<8xf32>
      %17 = vector.shape_cast %16 : vector<8xf32> to vector<8x1xf32>
      %18 = vector.broadcast %17 : vector<8x1xf32> to vector<8x8xf32>
      %19 = arith.subf %15, %18 : vector<8x8xf32>
      %20 = math.exp %19 : vector<8x8xf32>
      %cst_12 = arith.constant dense<0.000000e+00> : vector<8xf32>
      %21 = vector.multi_reduction <add>, %20, %cst_12 [1] : vector<8x8xf32> to vector<8xf32>
      %22 = vector.shape_cast %21 : vector<8xf32> to vector<8x1xf32>
      %23 = math.log %22 : vector<8x1xf32>
      %24 = vector.broadcast %23 : vector<8x1xf32> to vector<8x8xf32>
      %25 = arith.subf %19, %24 : vector<8x8xf32>
      %c0_13 = arith.constant 0 : index
      %c0_14 = arith.constant 0 : index
      %26 = vector.load %arg5[%c0_13, %c0_14] : memref<8x8xf32, #tpu.memory_space<vmem>>, vector<8x8xf32>
      tpu.vector_store %arg5[%c0_13, %c0_14], %25 {strides = array<i32>} : memref<8x8xf32, #tpu.memory_space<vmem>>, vector<8x8xf32>,
    } else {
    }
    return
  }
  func.func @transform_0(%arg0: i32, %arg1: i32) -> (i32, i32) {
    %c0_i32 = arith.constant 0 : i32
    return %arg0, %arg1 : i32, i32
  }
  func.func @transform_1(%arg0: i32, %arg1: i32) -> (i32, i32) {
    %c0_i32 = arith.constant 0 : i32
    %c0_i32_0 = arith.constant 0 : i32
    %c0_i32_1 = arith.constant 0 : i32
    return %c0_i32, %c0_i32_0 : i32, i32
  }
  func.func @transform_2(%arg0: i32, %arg1: i32) -> (i32, i32) {
    %c0_i32 = arith.constant 0 : i32
    %c0_i32_0 = arith.constant 0 : i32
    %c0_i32_1 = arith.constant 0 : i32
    return %c0_i32, %c0_i32_0 : i32, i32
  }
  func.func @transform_3(%arg0: i32, %arg1: i32) -> (i32, i32) {
    %c0_i32 = arith.constant 0 : i32
    %c0_i32_0 = arith.constant 0 : i32
    return %arg0, %c0_i32 : i32, i32
  }
}

</mosaic_0001>

<bundles_post_ra>
// kernel: tpu_custom_call.1
= control target key start
LH: loop header
LB: loop body
LE: loop exit
PB: predicated region body
PF: predicated region fallthrough
CT: control target
= control target key end

     0   :  { %8 = vsyncpa [#allocation4], 0  ;;  %s291_s0 = inlined_call_operand.hbm [shape: f32[8,128], index: 0, kind: input, shape index: {}]   ;;  %s292_s1 = inlined_call_operand.hbm [shape: f32[8,128], index: 1, kind: input, shape index: {}]   ;;  %s293_s2 = inlined_call_operand.vmem [shape: f32[1,8], index: 2, kind: input, shape index: {}]   ;;  %s294_s3 = inlined_call_operand.hbm [shape: f32[8,8], index: 3, kind: output, shape index: {}]  }
   0x1   :  { %9 = vsyncpa [#allocation7], 0 }
   0x2   :  { %10 = vsyncpa [#allocation5], 0  ;;  %s249_s12 = smov [#allocation3]   ;;  %s250_s14 = smov [#allocation6]  }
   0x3   :  { %s17_s13 = sshll.u32 %s249_s12, 4  ;;  %s27_s15 = sshll.u32 %s250_s14, 4  ;;  %s18_s13 = int_to_ptr.vmem [resolvable:$true] %s17_s13  ;;  %s28_s15 = int_to_ptr.vmem [resolvable:$true] %s27_s15 }
   0x4   :  { %s191_s16 = scalar_lea.vmem %s18_s13, 128  ;;  %p196_p1 = scmp.lt.s32.totalorder %s18_s13, %s18_s13 }
   0x5   :  { %p192_p0 = scmp.ne.s32.totalorder %s18_s13, %s191_s16  ;;  %p197_p2 = scmp.lt.s32.totalorder %s191_s16, %s191_s16 }
   0x7   :  { %p198_p3 = por %p197_p2, %p196_p1 }
   0x9   :  { %p199_p4 = pnand %p198_p3, %p192_p0 }
   0xb   :  { %202 = shalt.err (!%p199_p4)
}
   0xc   :  { %20 = dma.hbm_to_vmem [thread:$0]  %s291_s0, 128, %s18_s13, [#allocation4]  }
   0xd   :  { %s211_s19 = scalar_lea.vmem %s28_s15, 128  ;;  %p216_p6 = scmp.lt.s32.totalorder %s28_s15, %s28_s15 }
   0xe   :  { %p212_p5 = scmp.ne.s32.totalorder %s28_s15, %s211_s19  ;;  %p217_p7 = scmp.lt.s32.totalorder %s211_s19, %s211_s19 }
  0x10   :  { %p218_p8 = por %p217_p7, %p216_p6 }
  0x12   :  { %p219_p9 = pnand %p218_p8, %p212_p5 }
  0x14   :  { %222 = shalt.err (!%p219_p9)
}
  0x15   :  { %30 = dma.hbm_to_vmem [thread:$0]  %s292_s1, 128, %s28_s15, [#allocation7]  }
  0x16   :  { %243 = dma.done.wait [#allocation4], 128  }
  0x17   :  { %244 = vsyncadd [#allocation4], 4294967168 }
  0x18   :  { %245 = dma.done.wait [#allocation7], 128  }
  0x19   :  { %246 = vsyncadd [#allocation7], 4294967168  ;;  %v251_v0 = vmov 0.0   ;;  %vm252_vm0 = vmmov 0   ;;  %vm50_vm1 = vcmask 64512   ;;  %v56_v1 = vld [vmem:[#allocation6] sm:$0xff] }
  0x1a   :  { %169 = vmatprep.subr.mxu0 %v251_v0  ;;  %171 = vmatprep.mubr.msk.f32.mxu0 %vm252_vm0, %v251_v0  ;;  %v166_v2 = vld [vmem:[%s293_s2] ss:$0 sm:$0xff]  ;;  %v58_v3 = vld [vmem:[#allocation3] sm:$0xff]  ;;  %s253_s1 = smov [#allocation8]  }
  0x1b   :  { %170 = vmatpush3.xpose.msra.mxu0 %v56_v1  ;;  %51 = vst.msk [vmem:[#allocation2] sm:$0xff] %vm50_vm1, %v166_v2  ;;  %s155_s2 = sshll.u32 %s253_s1, 4  ;;  %s156_s2 = int_to_ptr.vmem [resolvable:$true] %s155_s2 }
  0x1c   :  { %s223_s23 = scalar_lea.vmem %s156_s2, 128  ;;  %p228_p11 = scmp.lt.s32.totalorder %s156_s2, %s156_s2 }
  0x1d   :  { %p224_p10 = scmp.ne.s32.totalorder %s156_s2, %s223_s23  ;;  %p229_p12 = scmp.lt.s32.totalorder %s223_s23, %s223_s23 }
  0x1e   :  { %172 = vmatmul.mubr.f32.vlgmr.msra.gmra.mxu0 %v58_v3 }
  0x1f   :  { %p230_p13 = por %p229_p12, %p228_p11 }
  0x21   :  { %p231_p0 = pnand %p230_p13, %p224_p10 }
  0x22   :  { %v57_v4 = vld [vmem:[#allocation2] sm:$0xff] }
  0xde   :  { %v125_v5 = vpop.f32.mrf.mxu0 }
  0xdf   :  { %v129_v6 = vadd.f32 %v125_v5, %v57_v4 }
  0xe0   :  { %v173_v7 = vpop.f32.mrf.mxu0 }
  0xe1   :  { %131 = vst.msk [vmem:[#allocation2] sm:$0xff] %vm50_vm1, %v129_v6 }
  0xe8   :  { %v135_v8 = vld [vmem:[#allocation2] sm:$0xff] }
  0xe9   :  { %v136_v9 = vsel %vm50_vm1, %v135_v8, -inf }
  0xea   :  { %137 = vmax.xlane.f32.xlu0 %v136_v9 }
 0x173   :  { %v138_v10 = vpop.xlane.xlu0 %137 }
 0x174   :  { %v139_v11 = vsub.f32 %v135_v8, %v138_v10 }
 0x176   :  { %v140_v12 = vmul.f32 1.442695, %v139_v11 }
 0x178   :  { %179 = vpow2.f32 %v140_v12 }
 0x185   :  { %v180_v13 = vpop.eup %179 }
 0x186   :  { %v142_v14 = vsel %vm50_vm1, %v180_v13, 0.0 }
 0x187   :  { %143 = vadd.xlane.f32.xlu0 %v142_v14 }
 0x210   :  { %v144_v15 = vpop.xlane.xlu0 %143 }
 0x211   :  { %181 = vlog2.f32 %v144_v15 }
 0x21e   :  { %v182_v16 = vpop.eup %181 }
 0x21f   :  { %v146_v17 = vmul.f32 0.6931472, %v182_v16 }
 0x221   :  { %v147_v18 = vsub.f32 %v139_v11, %v146_v17 }
 0x223   :  { %148 = vst.msk [vmem:[#allocation8] sm:$0xff] %vm50_vm1, %v147_v18 }
 0x224   :  { %234 = shalt.err (!%p231_p0)
}
 0x225   :  { %158 = dma.vmem_to_hbm [thread:$0]  %s156_s2, 128, %s294_s3, [#allocation5]  }
 0x226   :  { %247 = dma.done.wait [#allocation5], 128  }
 0x227   :  { %248 = vsyncadd [#allocation5], 4294967168 }
 0x228   :  { %162 = vsyncpa [#allocation4], 1 }
 0x229   :  { %163 = vsyncpa [#allocation7], 1 }
 0x22a   :  { %164 = vsyncpa [#allocation5], 1 }

</bundles_post_ra>
